<compile_context>
chip_gen: v5e
topology: v5e:2x2
jax: 0.10.0
libtpu: 0.0.40
codegen_flags: <defaults>
</compile_context>

<pallas_src>
import jax
import jax.numpy as jnp
from jax.experimental import pallas as pl
from jax.experimental.pallas import tpu as pltpu


def _const_spec(arr):
    nd = arr.ndim
    return pl.BlockSpec(arr.shape, lambda b, _nd=nd: (0,) * _nd)


def make_fsmn_kernel(num_units, unit_in_dims, proj_dim, shifts, T, C, matmul_dtype):
    """Builds the fused per-batch kernel. All activations are (C*T, feat) tiles."""
    TC = T * C

    def shift_rows(v, rows):
        # out[i] = v[i - rows], zero-filled (rows < 0 looks into the future).
        n, d = v.shape
        if rows == 0:
            return v
        if abs(rows) >= n:
            return jnp.zeros_like(v)
        zeros = jnp.zeros((abs(rows), d), v.dtype)
        if rows > 0:
            return jnp.concatenate([zeros, v[: n - rows, :]], axis=0)
        return jnp.concatenate([v[-rows:, :], zeros], axis=0)

    def kernel(*refs):
        x_ref = refs[0]
        off = 1
        unit_refs = [refs[off + 4 * i: off + 4 * i + 4] for i in range(num_units)]
        off += 4 * num_units
        we2_r, be2_r, wd_r, bd_r = refs[off: off + 4]
        out_ref = refs[off + 4]

        h = x_ref[...]                                    # (C*T, Din) f32
        for i in range(num_units):
            we_r, be_r, ws_r, coef_r = unit_refs[i]
            # AffineTransform (expand) + relu   -- bf16 MXU operands, f32 accum
            a = jnp.maximum(
                jnp.dot(h.astype(matmul_dtype), we_r[...],
                        preferred_element_type=jnp.float32) + be_r[...],
                0.0)
            # LinearTransform (shrink), no bias
            p = jnp.dot(a.astype(matmul_dtype), ws_r[...],
                        preferred_element_type=jnp.float32)
            # Fsmn memory: identity + per-feature weighted temporal shifts.
            coef = coef_r[...]                            # (n_taps, P) f32
            m = p
            for j, s in enumerate(shifts):
                m = m + shift_rows(p, s * C) * coef[j:j + 1, :]
            # DFSMNUnit residual only when in/out dims match.
            h = h + m if unit_in_dims[i] == proj_dim else m

        # expand2 + relu
        feat = jnp.maximum(
            jnp.dot(h.astype(matmul_dtype), we2_r[...],
                    preferred_element_type=jnp.float32) + be2_r[...],
            0.0)                                          # (C*T, E), >= 0
        # Channel max-pool: row t*C of `pooled` = max_c feat[t*C + c].
        pooled = feat
        for c in range(1, C):
            pooled = jnp.maximum(pooled, shift_rows(feat, -c))
        # Decision affine into a lane-dense 128-wide slab; wrapper keeps
        # rows ::C and the first num_syn columns.
        z = jnp.dot(pooled.astype(matmul_dtype), wd_r[...],
                    preferred_element_type=jnp.float32) + bd_r[...]
        out_ref[...] = z.astype(out_ref.dtype)

    return kernel


def fsmn_sele_net_v3(x, params, cfg, matmul_dtype=jnp.bfloat16):
    """x: [batch, time, channel, feature] -> [batch, time, num_syn]."""
    B, T, C, Din = x.shape
    L = cfg["fsmn_layers"]
    lorder, rorder = cfg["lorder"], cfg["rorder"]
    P, E, S = cfg["proj_dim"], cfg["linear_dim"], cfg["num_syn"]
    S_pad = pl.cdiv(S, 128) * 128                         # lane-dense output
    TC = T * C
    # Tap j < lorder looks j frames into the past (weight wl[:, lorder-1-j]);
    # tap lorder+k looks k+1 frames into the future (weight wr[:, k]).
    shifts = tuple(range(lorder)) + tuple(-(k + 1) for k in range(rorder))

    # Free, contiguous flatten (no HBM transpose needed).
    x_flat = x.astype(jnp.float32).reshape(B, TC, Din)

    inputs = [x_flat]
    in_specs = [pl.BlockSpec((None, TC, Din), lambda b: (b, 0, 0))]
    unit_in_dims = []
    for unit in params["units"]:
        we = unit["we"].astype(matmul_dtype)
        be = unit["be"].reshape(1, -1).astype(jnp.float32)
        ws = unit["ws"].astype(matmul_dtype)
        coef = jnp.concatenate([unit["wl"][:, ::-1].T, unit["wr"].T],
                               axis=0).astype(jnp.float32)   # (n_taps, P)
        for arr in (we, be, ws, coef):
            inputs.append(arr)
            in_specs.append(_const_spec(arr))
        unit_in_dims.append(unit["we"].shape[0])

    we2 = params["we2"].astype(matmul_dtype)
    be2 = params["be2"].reshape(1, -1).astype(jnp.float32)
    wd_pad = jnp.pad(params["wd"], ((0, 0), (0, S_pad - S))).astype(matmul_dtype)
    bd_pad = jnp.pad(params["bd"].reshape(1, -1),
                     ((0, 0), (0, S_pad - S))).astype(jnp.float32)
    for arr in (we2, be2, wd_pad, bd_pad):
        inputs.append(arr)
        in_specs.append(_const_spec(arr))

    kernel = make_fsmn_kernel(L, tuple(unit_in_dims), P, shifts, T, C, matmul_dtype)

    # Advisory cost estimate so XLA schedules surrounding ops sensibly.
    flops = 0
    din = Din
    for _ in range(L):
        flops += 2 * TC * (din * E + E * P) + 2 * TC * P * (len(shifts) + 1)
        din = P
    flops += 2 * TC * P * E + 2 * TC * E * S_pad
    flops *= B
    bytes_accessed = sum(int(a.size) * a.dtype.itemsize for a in inputs) \
        + B * TC * S_pad * 4
    cost = pl.CostEstimate(flops=int(flops), transcendentals=0,
                           bytes_accessed=int(bytes_accessed))

    out = pl.pallas_call(
        kernel,
        out_shape=jax.ShapeDtypeStruct((B, TC, S_pad), jnp.float32),
        grid_spec=pltpu.PrefetchScalarGridSpec(
            num_scalar_prefetch=0,
            grid=(B,),
            in_specs=in_specs,
            out_specs=pl.BlockSpec((None, TC, S_pad), lambda b: (b, 0, 0)),
        ),
        compiler_params=pltpu.CompilerParams(
            dimension_semantics=("parallel",)),
        cost_estimate=cost,
    )(*inputs)

    # Rows t*C hold the channel-pooled logits; drop the lane padding.
    return out[:, ::C, :S]


# ---------------- pure-JAX reference (mirrors the PyTorch semantics) ----------------

def _mm(a, w, dt):
    return jnp.dot(a.astype(dt), w.astype(dt), preferred_element_type=jnp.float32)


def _fsmn_memory_ref(p, wl, wr, lorder, rorder):
    T = p.shape[0]
    out = p
    for j in range(lorder):
        w = wl[:, lorder - 1 - j]
        shifted = jnp.pad(p, ((j, 0), (0, 0)))[:T]
        out = out + shifted * w
    for k in range(rorder):
        w = wr[:, k]
        shifted = jnp.pad(p, ((0, k + 1), (0, 0)))[k + 1:]
        out = out + shifted * w
    return out


def forward_ref(x, params, cfg, matmul_dtype=jnp.float32):
    B, T, C, _ = x.shape
    lorder, rorder = cfg["lorder"], cfg["rorder"]
    outs = []
    for b in range(B):
        feats = []
        for c in range(C):
            h = x[b, :, c, :]
            for unit in params["units"]:
                a = jnp.maximum(_mm(h, unit["we"], matmul_dtype) + unit["be"], 0.0)
                p = _mm(a, unit["ws"], matmul_dtype)
                m = _fsmn_memory_ref(p, unit["wl"], unit["wr"], lorder, rorder)
                h = h + m if h.shape[-1] == m.shape[-1] else m
            feats.append(jnp.maximum(
                _mm(h, params["we2"], matmul_dtype) + params["be2"], 0.0))
        pooled = jnp.max(jnp.stack(feats, 0), axis=0)
        outs.append(_mm(pooled, params["wd"], matmul_dtype) + params["bd"])
    return jnp.stack(outs, 0)


def init_params(key, cfg):
    L = cfg["fsmn_layers"]
    E, P = cfg["linear_dim"], cfg["proj_dim"]
    lorder, rorder = cfg["lorder"], cfg["rorder"]

    def dense(k, fan_in, fan_out):
        return jax.random.normal(k, (fan_in, fan_out), jnp.float32) / jnp.sqrt(fan_in)

    keys = jax.random.split(key, L * 5 + 4)
    units, din, ki = [], cfg["input_dim"], 0
    for _ in range(L):
        units.append({
            "we": dense(keys[ki], din, E),
            "be": 0.1 * jax.random.normal(keys[ki + 1], (E,), jnp.float32),
            "ws": dense(keys[ki + 2], E, P),
            "wl": 0.1 * jax.random.normal(keys[ki + 3], (P, lorder), jnp.float32),
            "wr": 0.1 * jax.random.normal(keys[ki + 4], (P, rorder), jnp.float32),
        })
        ki += 5
        din = P
    return {
        "units": units,
        "we2": dense(keys[ki], P, E),
        "be2": 0.1 * jax.random.normal(keys[ki + 1], (E,), jnp.float32),
        "wd": dense(keys[ki + 2], E, cfg["num_syn"]),
        "bd": 0.1 * jax.random.normal(keys[ki + 3], (cfg["num_syn"],), jnp.float32),
    }


if __name__ == "__main__":
    cfg = dict(input_dim=20, linear_dim=32, proj_dim=16, lorder=4, rorder=1,
               num_syn=5, fsmn_layers=3)
    B, T, C = 2, 8, 2

    key = jax.random.PRNGKey(0)
    kx, kp = jax.random.split(key)
    x = jax.random.normal(kx, (B, T, C, cfg["input_dim"]), jnp.float32)
    params = init_params(kp, cfg)

    out = jax.block_until_ready(fsmn_sele_net_v3(x, params, cfg))
    assert out.shape == (B, T, cfg["num_syn"])

    # Structural check: reference using the same bf16-operand / f32-accumulate
    # matmul numerics -> any residual difference is accumulation-order only.
    ref_bf16 = forward_ref(x, params, cfg, matmul_dtype=jnp.bfloat16)
    err = float(jnp.max(jnp.abs(out - ref_bf16)))
    assert err < 1e-2, f"mismatch vs bf16-matmul reference: {err}"

    # Numerics sanity vs the pure-f32 reference (bf16 MXU operands).
    ref_f32 = forward_ref(x, params, cfg, matmul_dtype=jnp.float32)
    rel = float(jnp.max(jnp.abs(out - ref_f32))) / (1.0 + float(jnp.max(jnp.abs(ref_f32))))
    assert rel < 5e-2, f"bf16 numerics off: rel={rel}"

    print("KERNEL_OK")
</pallas_src>

<mosaic_0001>
module attributes {stable_mosaic.version = 11 : i64} {
  func.func @kernel(%arg0: i32, %arg1: memref<1x16x20xf32, #tpu.memory_space<vmem>>, %arg2: memref<20x32xbf16, #tpu.memory_space<vmem>>, %arg3: memref<1x32xf32, #tpu.memory_space<vmem>>, %arg4: memref<32x16xbf16, #tpu.memory_space<vmem>>, %arg5: memref<5x16xf32, #tpu.memory_space<vmem>>, %arg6: memref<16x32xbf16, #tpu.memory_space<vmem>>, %arg7: memref<1x32xf32, #tpu.memory_space<vmem>>, %arg8: memref<32x16xbf16, #tpu.memory_space<vmem>>, %arg9: memref<5x16xf32, #tpu.memory_space<vmem>>, %arg10: memref<16x32xbf16, #tpu.memory_space<vmem>>, %arg11: memref<1x32xf32, #tpu.memory_space<vmem>>, %arg12: memref<32x16xbf16, #tpu.memory_space<vmem>>, %arg13: memref<5x16xf32, #tpu.memory_space<vmem>>, %arg14: memref<16x32xbf16, #tpu.memory_space<vmem>>, %arg15: memref<1x32xf32, #tpu.memory_space<vmem>>, %arg16: memref<32x128xbf16, #tpu.memory_space<vmem>>, %arg17: memref<1x128xf32, #tpu.memory_space<vmem>>, %arg18: memref<1x16x128xf32, #tpu.memory_space<vmem>>) attributes {dimension_semantics = [#tpu.dimension_semantics<parallel>], iteration_bounds = array<i64: 2>, scalar_prefetch = 0 : i64, scratch_operands = 0 : i64, tpu.core_type = #tpu.core_type<tc>, window_params = [{transform_indices = @transform_0, window_bounds = array<i64: 1, 16, 20>}, {pipeline_mode = #tpu.pipeline_mode<synchronous>, transform_indices = @transform_1, window_bounds = array<i64: 20, 32>}, {pipeline_mode = #tpu.pipeline_mode<synchronous>, transform_indices = @transform_2, window_bounds = array<i64: 1, 32>}, {pipeline_mode = #tpu.pipeline_mode<synchronous>, transform_indices = @transform_3, window_bounds = array<i64: 32, 16>}, {pipeline_mode = #tpu.pipeline_mode<synchronous>, transform_indices = @transform_4, window_bounds = array<i64: 5, 16>}, {pipeline_mode = #tpu.pipeline_mode<synchronous>, transform_indices = @transform_5, window_bounds = array<i64: 16, 32>}, {pipeline_mode = #tpu.pipeline_mode<synchronous>, transform_indices = @transform_6, window_bounds = array<i64: 1, 32>}, {pipeline_mode = #tpu.pipeline_mode<synchronous>, transform_indices = @transform_7, window_bounds = array<i64: 32, 16>}, {pipeline_mode = #tpu.pipeline_mode<synchronous>, transform_indices = @transform_8, window_bounds = array<i64: 5, 16>}, {pipeline_mode = #tpu.pipeline_mode<synchronous>, transform_indices = @transform_9, window_bounds = array<i64: 16, 32>}, {pipeline_mode = #tpu.pipeline_mode<synchronous>, transform_indices = @transform_10, window_bounds = array<i64: 1, 32>}, {pipeline_mode = #tpu.pipeline_mode<synchronous>, transform_indices = @transform_11, window_bounds = array<i64: 32, 16>}, {pipeline_mode = #tpu.pipeline_mode<synchronous>, transform_indices = @transform_12, window_bounds = array<i64: 5, 16>}, {pipeline_mode = #tpu.pipeline_mode<synchronous>, transform_indices = @transform_13, window_bounds = array<i64: 16, 32>}, {pipeline_mode = #tpu.pipeline_mode<synchronous>, transform_indices = @transform_14, window_bounds = array<i64: 1, 32>}, {pipeline_mode = #tpu.pipeline_mode<synchronous>, transform_indices = @transform_15, window_bounds = array<i64: 32, 128>}, {pipeline_mode = #tpu.pipeline_mode<synchronous>, transform_indices = @transform_16, window_bounds = array<i64: 1, 128>}, {transform_indices = @transform_17, window_bounds = array<i64: 1, 16, 128>}]} {
    %c0 = arith.constant 0 : index
    %c0_0 = arith.constant 0 : index
    %c0_1 = arith.constant 0 : index
    %0 = vector.load %arg1[%c0, %c0_0, %c0_1] : memref<1x16x20xf32, #tpu.memory_space<vmem>>, vector<1x16x20xf32>
    %1 = vector.shape_cast %0 : vector<1x16x20xf32> to vector<16x20xf32>
    %2 = arith.truncf %1 : vector<16x20xf32> to vector<16x20xbf16>
    %c0_2 = arith.constant 0 : index
    %c0_3 = arith.constant 0 : index
    %3 = vector.load %arg2[%c0_2, %c0_3] : memref<20x32xbf16, #tpu.memory_space<vmem>>, vector<20x32xbf16>
    %cst = arith.constant dense<0.000000e+00> : vector<16x32xf32>
    %4 = tpu.matmul %2, %3, %cst {dimension_numbers = #tpu.dot_dimension_numbers<[1], [0], [0], [1], [0, 0, 1, 1], [], []>} : vector<16x20xbf16>, vector<20x32xbf16>, vector<16x32xf32> -> vector<16x32xf32>
    %c0_4 = arith.constant 0 : index
    %c0_5 = arith.constant 0 : index
    %5 = vector.load %arg3[%c0_4, %c0_5] : memref<1x32xf32, #tpu.memory_space<vmem>>, vector<1x32xf32>
    %6 = vector.broadcast %5 : vector<1x32xf32> to vector<16x32xf32>
    %7 = arith.addf %4, %6 : vector<16x32xf32>
    %cst_6 = arith.constant 0.000000e+00 : f32
    %8 = vector.broadcast %cst_6 : f32 to vector<16x32xf32>
    %9 = arith.maximumf %7, %8 : vector<16x32xf32>
    %10 = arith.truncf %9 : vector<16x32xf32> to vector<16x32xbf16>
    %c0_7 = arith.constant 0 : index
    %c0_8 = arith.constant 0 : index
    %11 = vector.load %arg4[%c0_7, %c0_8] : memref<32x16xbf16, #tpu.memory_space<vmem>>, vector<32x16xbf16>
    %cst_9 = arith.constant dense<0.000000e+00> : vector<16x16xf32>
    %12 = tpu.matmul %10, %11, %cst_9 {dimension_numbers = #tpu.dot_dimension_numbers<[1], [0], [0], [1], [0, 0, 1, 1], [], []>} : vector<16x32xbf16>, vector<32x16xbf16>, vector<16x16xf32> -> vector<16x16xf32>
    %c0_10 = arith.constant 0 : index
    %c0_11 = arith.constant 0 : index
    %13 = vector.load %arg5[%c0_10, %c0_11] : memref<5x16xf32, #tpu.memory_space<vmem>>, vector<5x16xf32>
    %14 = vector.extract_strided_slice %13 {offsets = [0, 0], sizes = [1, 16], strides = [1, 1]} : vector<5x16xf32> to vector<1x16xf32>
    %15 = vector.broadcast %14 : vector<1x16xf32> to vector<16x16xf32>
    %16 = arith.mulf %12, %15 : vector<16x16xf32>
    %17 = arith.addf %12, %16 : vector<16x16xf32>
    %cst_12 = arith.constant 0.000000e+00 : f32
    %18 = vector.broadcast %cst_12 : f32 to vector<2x16xf32>
    %19 = vector.extract_strided_slice %12 {offsets = [0, 0], sizes = [14, 16], strides = [1, 1]} : vector<16x16xf32> to vector<14x16xf32>
    %20 = tpu.concatenate %18, %19 in 0 : vector<2x16xf32>, vector<14x16xf32> -> vector<16x16xf32>
    %21 = vector.extract_strided_slice %13 {offsets = [1, 0], sizes = [1, 16], strides = [1, 1]} : vector<5x16xf32> to vector<1x16xf32>
    %22 = vector.broadcast %21 : vector<1x16xf32> to vector<16x16xf32>
    %23 = arith.mulf %20, %22 : vector<16x16xf32>
    %24 = arith.addf %17, %23 : vector<16x16xf32>
    %cst_13 = arith.constant 0.000000e+00 : f32
    %25 = vector.broadcast %cst_13 : f32 to vector<4x16xf32>
    %26 = vector.extract_strided_slice %12 {offsets = [0, 0], sizes = [12, 16], strides = [1, 1]} : vector<16x16xf32> to vector<12x16xf32>
    %27 = tpu.concatenate %25, %26 in 0 : vector<4x16xf32>, vector<12x16xf32> -> vector<16x16xf32>
    %28 = vector.extract_strided_slice %13 {offsets = [2, 0], sizes = [1, 16], strides = [1, 1]} : vector<5x16xf32> to vector<1x16xf32>
    %29 = vector.broadcast %28 : vector<1x16xf32> to vector<16x16xf32>
    %30 = arith.mulf %27, %29 : vector<16x16xf32>
    %31 = arith.addf %24, %30 : vector<16x16xf32>
    %cst_14 = arith.constant 0.000000e+00 : f32
    %32 = vector.broadcast %cst_14 : f32 to vector<6x16xf32>
    %33 = vector.extract_strided_slice %12 {offsets = [0, 0], sizes = [10, 16], strides = [1, 1]} : vector<16x16xf32> to vector<10x16xf32>
    %34 = tpu.concatenate %32, %33 in 0 : vector<6x16xf32>, vector<10x16xf32> -> vector<16x16xf32>
    %35 = vector.extract_strided_slice %13 {offsets = [3, 0], sizes = [1, 16], strides = [1, 1]} : vector<5x16xf32> to vector<1x16xf32>
    %36 = vector.broadcast %35 : vector<1x16xf32> to vector<16x16xf32>
    %37 = arith.mulf %34, %36 : vector<16x16xf32>
    %38 = arith.addf %31, %37 : vector<16x16xf32>
    %cst_15 = arith.constant 0.000000e+00 : f32
    %39 = vector.broadcast %cst_15 : f32 to vector<2x16xf32>
    %40 = vector.extract_strided_slice %12 {offsets = [2, 0], sizes = [14, 16], strides = [1, 1]} : vector<16x16xf32> to vector<14x16xf32>
    %41 = tpu.concatenate %40, %39 in 0 : vector<14x16xf32>, vector<2x16xf32> -> vector<16x16xf32>
    %42 = vector.extract_strided_slice %13 {offsets = [4, 0], sizes = [1, 16], strides = [1, 1]} : vector<5x16xf32> to vector<1x16xf32>
    %43 = vector.broadcast %42 : vector<1x16xf32> to vector<16x16xf32>
    %44 = arith.mulf %41, %43 : vector<16x16xf32>
    %45 = arith.addf %38, %44 : vector<16x16xf32>
    %46 = arith.truncf %45 : vector<16x16xf32> to vector<16x16xbf16>
    %c0_16 = arith.constant 0 : index
    %c0_17 = arith.constant 0 : index
    %47 = vector.load %arg6[%c0_16, %c0_17] : memref<16x32xbf16, #tpu.memory_space<vmem>>, vector<16x32xbf16>
    %cst_18 = arith.constant dense<0.000000e+00> : vector<16x32xf32>
    %48 = tpu.matmul %46, %47, %cst_18 {dimension_numbers = #tpu.dot_dimension_numbers<[1], [0], [0], [1], [0, 0, 1, 1], [], []>} : vector<16x16xbf16>, vector<16x32xbf16>, vector<16x32xf32> -> vector<16x32xf32>
    %c0_19 = arith.constant 0 : index
    %c0_20 = arith.constant 0 : index
    %49 = vector.load %arg7[%c0_19, %c0_20] : memref<1x32xf32, #tpu.memory_space<vmem>>, vector<1x32xf32>
    %50 = vector.broadcast %49 : vector<1x32xf32> to vector<16x32xf32>
    %51 = arith.addf %48, %50 : vector<16x32xf32>
    %cst_21 = arith.constant 0.000000e+00 : f32
    %52 = vector.broadcast %cst_21 : f32 to vector<16x32xf32>
    %53 = arith.maximumf %51, %52 : vector<16x32xf32>
    %54 = arith.truncf %53 : vector<16x32xf32> to vector<16x32xbf16>
    %c0_22 = arith.constant 0 : index
    %c0_23 = arith.constant 0 : index
    %55 = vector.load %arg8[%c0_22, %c0_23] : memref<32x16xbf16, #tpu.memory_space<vmem>>, vector<32x16xbf16>
    %cst_24 = arith.constant dense<0.000000e+00> : vector<16x16xf32>
    %56 = tpu.matmul %54, %55, %cst_24 {dimension_numbers = #tpu.dot_dimension_numbers<[1], [0], [0], [1], [0, 0, 1, 1], [], []>} : vector<16x32xbf16>, vector<32x16xbf16>, vector<16x16xf32> -> vector<16x16xf32>
    %c0_25 = arith.constant 0 : index
    %c0_26 = arith.constant 0 : index
    %57 = vector.load %arg9[%c0_25, %c0_26] : memref<5x16xf32, #tpu.memory_space<vmem>>, vector<5x16xf32>
    %58 = vector.extract_strided_slice %57 {offsets = [0, 0], sizes = [1, 16], strides = [1, 1]} : vector<5x16xf32> to vector<1x16xf32>
    %59 = vector.broadcast %58 : vector<1x16xf32> to vector<16x16xf32>
    %60 = arith.mulf %56, %59 : vector<16x16xf32>
    %61 = arith.addf %56, %60 : vector<16x16xf32>
    %cst_27 = arith.constant 0.000000e+00 : f32
    %62 = vector.broadcast %cst_27 : f32 to vector<2x16xf32>
    %63 = vector.extract_strided_slice %56 {offsets = [0, 0], sizes = [14, 16], strides = [1, 1]} : vector<16x16xf32> to vector<14x16xf32>
    %64 = tpu.concatenate %62, %63 in 0 : vector<2x16xf32>, vector<14x16xf32> -> vector<16x16xf32>
    %65 = vector.extract_strided_slice %57 {offsets = [1, 0], sizes = [1, 16], strides = [1, 1]} : vector<5x16xf32> to vector<1x16xf32>
    %66 = vector.broadcast %65 : vector<1x16xf32> to vector<16x16xf32>
    %67 = arith.mulf %64, %66 : vector<16x16xf32>
    %68 = arith.addf %61, %67 : vector<16x16xf32>
    %cst_28 = arith.constant 0.000000e+00 : f32
    %69 = vector.broadcast %cst_28 : f32 to vector<4x16xf32>
    %70 = vector.extract_strided_slice %56 {offsets = [0, 0], sizes = [12, 16], strides = [1, 1]} : vector<16x16xf32> to vector<12x16xf32>
    %71 = tpu.concatenate %69, %70 in 0 : vector<4x16xf32>, vector<12x16xf32> -> vector<16x16xf32>
    %72 = vector.extract_strided_slice %57 {offsets = [2, 0], sizes = [1, 16], strides = [1, 1]} : vector<5x16xf32> to vector<1x16xf32>
    %73 = vector.broadcast %72 : vector<1x16xf32> to vector<16x16xf32>
    %74 = arith.mulf %71, %73 : vector<16x16xf32>
    %75 = arith.addf %68, %74 : vector<16x16xf32>
    %cst_29 = arith.constant 0.000000e+00 : f32
    %76 = vector.broadcast %cst_29 : f32 to vector<6x16xf32>
    %77 = vector.extract_strided_slice %56 {offsets = [0, 0], sizes = [10, 16], strides = [1, 1]} : vector<16x16xf32> to vector<10x16xf32>
    %78 = tpu.concatenate %76, %77 in 0 : vector<6x16xf32>, vector<10x16xf32> -> vector<16x16xf32>
    %79 = vector.extract_strided_slice %57 {offsets = [3, 0], sizes = [1, 16], strides = [1, 1]} : vector<5x16xf32> to vector<1x16xf32>
    %80 = vector.broadcast %79 : vector<1x16xf32> to vector<16x16xf32>
    %81 = arith.mulf %78, %80 : vector<16x16xf32>
    %82 = arith.addf %75, %81 : vector<16x16xf32>
    %cst_30 = arith.constant 0.000000e+00 : f32
    %83 = vector.broadcast %cst_30 : f32 to vector<2x16xf32>
    %84 = vector.extract_strided_slice %56 {offsets = [2, 0], sizes = [14, 16], strides = [1, 1]} : vector<16x16xf32> to vector<14x16xf32>
    %85 = tpu.concatenate %84, %83 in 0 : vector<14x16xf32>, vector<2x16xf32> -> vector<16x16xf32>
    %86 = vector.extract_strided_slice %57 {offsets = [4, 0], sizes = [1, 16], strides = [1, 1]} : vector<5x16xf32> to vector<1x16xf32>
    %87 = vector.broadcast %86 : vector<1x16xf32> to vector<16x16xf32>
    %88 = arith.mulf %85, %87 : vector<16x16xf32>
    %89 = arith.addf %82, %88 : vector<16x16xf32>
    %90 = arith.addf %45, %89 : vector<16x16xf32>
    %91 = arith.truncf %90 : vector<16x16xf32> to vector<16x16xbf16>
    %c0_31 = arith.constant 0 : index
    %c0_32 = arith.constant 0 : index
    %92 = vector.load %arg10[%c0_31, %c0_32] : memref<16x32xbf16, #tpu.memory_space<vmem>>, vector<16x32xbf16>
    %cst_33 = arith.constant dense<0.000000e+00> : vector<16x32xf32>
    %93 = tpu.matmul %91, %92, %cst_33 {dimension_numbers = #tpu.dot_dimension_numbers<[1], [0], [0], [1], [0, 0, 1, 1], [], []>} : vector<16x16xbf16>, vector<16x32xbf16>, vector<16x32xf32> -> vector<16x32xf32>
    %c0_34 = arith.constant 0 : index
    %c0_35 = arith.constant 0 : index
    %94 = vector.load %arg11[%c0_34, %c0_35] : memref<1x32xf32, #tpu.memory_space<vmem>>, vector<1x32xf32>
    %95 = vector.broadcast %94 : vector<1x32xf32> to vector<16x32xf32>
    %96 = arith.addf %93, %95 : vector<16x32xf32>
    %cst_36 = arith.constant 0.000000e+00 : f32
    %97 = vector.broadcast %cst_36 : f32 to vector<16x32xf32>
    %98 = arith.maximumf %96, %97 : vector<16x32xf32>
    %99 = arith.truncf %98 : vector<16x32xf32> to vector<16x32xbf16>
    %c0_37 = arith.constant 0 : index
    %c0_38 = arith.constant 0 : index
    %100 = vector.load %arg12[%c0_37, %c0_38] : memref<32x16xbf16, #tpu.memory_space<vmem>>, vector<32x16xbf16>
    %cst_39 = arith.constant dense<0.000000e+00> : vector<16x16xf32>
    %101 = tpu.matmul %99, %100, %cst_39 {dimension_numbers = #tpu.dot_dimension_numbers<[1], [0], [0], [1], [0, 0, 1, 1], [], []>} : vector<16x32xbf16>, vector<32x16xbf16>, vector<16x16xf32> -> vector<16x16xf32>
    %c0_40 = arith.constant 0 : index
    %c0_41 = arith.constant 0 : index
    %102 = vector.load %arg13[%c0_40, %c0_41] : memref<5x16xf32, #tpu.memory_space<vmem>>, vector<5x16xf32>
    %103 = vector.extract_strided_slice %102 {offsets = [0, 0], sizes = [1, 16], strides = [1, 1]} : vector<5x16xf32> to vector<1x16xf32>
    %104 = vector.broadcast %103 : vector<1x16xf32> to vector<16x16xf32>
    %105 = arith.mulf %101, %104 : vector<16x16xf32>
    %106 = arith.addf %101, %105 : vector<16x16xf32>
    %cst_42 = arith.constant 0.000000e+00 : f32
    %107 = vector.broadcast %cst_42 : f32 to vector<2x16xf32>
    %108 = vector.extract_strided_slice %101 {offsets = [0, 0], sizes = [14, 16], strides = [1, 1]} : vector<16x16xf32> to vector<14x16xf32>
    %109 = tpu.concatenate %107, %108 in 0 : vector<2x16xf32>, vector<14x16xf32> -> vector<16x16xf32>
    %110 = vector.extract_strided_slice %102 {offsets = [1, 0], sizes = [1, 16], strides = [1, 1]} : vector<5x16xf32> to vector<1x16xf32>
    %111 = vector.broadcast %110 : vector<1x16xf32> to vector<16x16xf32>
    %112 = arith.mulf %109, %111 : vector<16x16xf32>
    %113 = arith.addf %106, %112 : vector<16x16xf32>
    %cst_43 = arith.constant 0.000000e+00 : f32
    %114 = vector.broadcast %cst_43 : f32 to vector<4x16xf32>
    %115 = vector.extract_strided_slice %101 {offsets = [0, 0], sizes = [12, 16], strides = [1, 1]} : vector<16x16xf32> to vector<12x16xf32>
    %116 = tpu.concatenate %114, %115 in 0 : vector<4x16xf32>, vector<12x16xf32> -> vector<16x16xf32>
    %117 = vector.extract_strided_slice %102 {offsets = [2, 0], sizes = [1, 16], strides = [1, 1]} : vector<5x16xf32> to vector<1x16xf32>
    %118 = vector.broadcast %117 : vector<1x16xf32> to vector<16x16xf32>
    %119 = arith.mulf %116, %118 : vector<16x16xf32>
    %120 = arith.addf %113, %119 : vector<16x16xf32>
    %cst_44 = arith.constant 0.000000e+00 : f32
    %121 = vector.broadcast %cst_44 : f32 to vector<6x16xf32>
    %122 = vector.extract_strided_slice %101 {offsets = [0, 0], sizes = [10, 16], strides = [1, 1]} : vector<16x16xf32> to vector<10x16xf32>
    %123 = tpu.concatenate %121, %122 in 0 : vector<6x16xf32>, vector<10x16xf32> -> vector<16x16xf32>
    %124 = vector.extract_strided_slice %102 {offsets = [3, 0], sizes = [1, 16], strides = [1, 1]} : vector<5x16xf32> to vector<1x16xf32>
    %125 = vector.broadcast %124 : vector<1x16xf32> to vector<16x16xf32>
    %126 = arith.mulf %123, %125 : vector<16x16xf32>
    %127 = arith.addf %120, %126 : vector<16x16xf32>
    %cst_45 = arith.constant 0.000000e+00 : f32
    %128 = vector.broadcast %cst_45 : f32 to vector<2x16xf32>
    %129 = vector.extract_strided_slice %101 {offsets = [2, 0], sizes = [14, 16], strides = [1, 1]} : vector<16x16xf32> to vector<14x16xf32>
    %130 = tpu.concatenate %129, %128 in 0 : vector<14x16xf32>, vector<2x16xf32> -> vector<16x16xf32>
    %131 = vector.extract_strided_slice %102 {offsets = [4, 0], sizes = [1, 16], strides = [1, 1]} : vector<5x16xf32> to vector<1x16xf32>
    %132 = vector.broadcast %131 : vector<1x16xf32> to vector<16x16xf32>
    %133 = arith.mulf %130, %132 : vector<16x16xf32>
    %134 = arith.addf %127, %133 : vector<16x16xf32>
    %135 = arith.addf %90, %134 : vector<16x16xf32>
    %136 = arith.truncf %135 : vector<16x16xf32> to vector<16x16xbf16>
    %c0_46 = arith.constant 0 : index
    %c0_47 = arith.constant 0 : index
    %137 = vector.load %arg14[%c0_46, %c0_47] : memref<16x32xbf16, #tpu.memory_space<vmem>>, vector<16x32xbf16>
    %cst_48 = arith.constant dense<0.000000e+00> : vector<16x32xf32>
    %138 = tpu.matmul %136, %137, %cst_48 {dimension_numbers = #tpu.dot_dimension_numbers<[1], [0], [0], [1], [0, 0, 1, 1], [], []>} : vector<16x16xbf16>, vector<16x32xbf16>, vector<16x32xf32> -> vector<16x32xf32>
    %c0_49 = arith.constant 0 : index
    %c0_50 = arith.constant 0 : index
    %139 = vector.load %arg15[%c0_49, %c0_50] : memref<1x32xf32, #tpu.memory_space<vmem>>, vector<1x32xf32>
    %140 = vector.broadcast %139 : vector<1x32xf32> to vector<16x32xf32>
    %141 = arith.addf %138, %140 : vector<16x32xf32>
    %cst_51 = arith.constant 0.000000e+00 : f32
    %142 = vector.broadcast %cst_51 : f32 to vector<16x32xf32>
    %143 = arith.maximumf %141, %142 : vector<16x32xf32>
    %cst_52 = arith.constant 0.000000e+00 : f32
    %144 = vector.broadcast %cst_52 : f32 to vector<1x32xf32>
    %145 = vector.extract_strided_slice %143 {offsets = [1, 0], sizes = [15, 32], strides = [1, 1]} : vector<16x32xf32> to vector<15x32xf32>
    %146 = tpu.concatenate %145, %144 in 0 : vector<15x32xf32>, vector<1x32xf32> -> vector<16x32xf32>
    %147 = arith.maximumf %143, %146 : vector<16x32xf32>
    %148 = arith.truncf %147 : vector<16x32xf32> to vector<16x32xbf16>
    %c0_53 = arith.constant 0 : index
    %c0_54 = arith.constant 0 : index
    %149 = vector.load %arg16[%c0_53, %c0_54] : memref<32x128xbf16, #tpu.memory_space<vmem>>, vector<32x128xbf16>
    %cst_55 = arith.constant dense<0.000000e+00> : vector<16x128xf32>
    %150 = tpu.matmul %148, %149, %cst_55 {dimension_numbers = #tpu.dot_dimension_numbers<[1], [0], [0], [1], [0, 0, 1, 1], [], []>} : vector<16x32xbf16>, vector<32x128xbf16>, vector<16x128xf32> -> vector<16x128xf32>
    %c0_56 = arith.constant 0 : index
    %c0_57 = arith.constant 0 : index
    %151 = vector.load %arg17[%c0_56, %c0_57] : memref<1x128xf32, #tpu.memory_space<vmem>>, vector<1x128xf32>
    %152 = vector.broadcast %151 : vector<1x128xf32> to vector<16x128xf32>
    %153 = arith.addf %150, %152 : vector<16x128xf32>
    %c0_58 = arith.constant 0 : index
    %c0_59 = arith.constant 0 : index
    %c0_60 = arith.constant 0 : index
    %154 = vector.load %arg18[%c0_58, %c0_59, %c0_60] : memref<1x16x128xf32, #tpu.memory_space<vmem>>, vector<1x16x128xf32>
    %155 = vector.shape_cast %154 : vector<1x16x128xf32> to vector<16x128xf32>
    %156 = vector.shape_cast %153 : vector<16x128xf32> to vector<1x16x128xf32>
    tpu.vector_store %arg18[%c0_58, %c0_59, %c0_60], %156 {strides = array<i32>} : memref<1x16x128xf32, #tpu.memory_space<vmem>>, vector<1x16x128xf32>,
    return
  }
  func.func @transform_0(%arg0: i32) -> (i32, i32, i32) {
    %c0_i32 = arith.constant 0 : i32
    %c0_i32_0 = arith.constant 0 : i32
    %c0_i32_1 = arith.constant 0 : i32
    return %arg0, %c0_i32, %c0_i32_0 : i32, i32, i32
  }
  func.func @transform_1(%arg0: i32) -> (i32, i32) {
    %c0_i32 = arith.constant 0 : i32
    %c0_i32_0 = arith.constant 0 : i32
    %c0_i32_1 = arith.constant 0 : i32
    return %c0_i32, %c0_i32_0 : i32, i32
  }
  func.func @transform_2(%arg0: i32) -> (i32, i32) {
    %c0_i32 = arith.constant 0 : i32
    %c0_i32_0 = arith.constant 0 : i32
    %c0_i32_1 = arith.constant 0 : i32
    return %c0_i32, %c0_i32_0 : i32, i32
  }
  func.func @transform_3(%arg0: i32) -> (i32, i32) {
    %c0_i32 = arith.constant 0 : i32
    %c0_i32_0 = arith.constant 0 : i32
    %c0_i32_1 = arith.constant 0 : i32
    return %c0_i32, %c0_i32_0 : i32, i32
  }
  func.func @transform_4(%arg0: i32) -> (i32, i32) {
    %c0_i32 = arith.constant 0 : i32
    %c0_i32_0 = arith.constant 0 : i32
    %c0_i32_1 = arith.constant 0 : i32
    return %c0_i32, %c0_i32_0 : i32, i32
  }
  func.func @transform_5(%arg0: i32) -> (i32, i32) {
    %c0_i32 = arith.constant 0 : i32
    %c0_i32_0 = arith.constant 0 : i32
    %c0_i32_1 = arith.constant 0 : i32
    return %c0_i32, %c0_i32_0 : i32, i32
  }
  func.func @transform_6(%arg0: i32) -> (i32, i32) {
    %c0_i32 = arith.constant 0 : i32
    %c0_i32_0 = arith.constant 0 : i32
    %c0_i32_1 = arith.constant 0 : i32
    return %c0_i32, %c0_i32_0 : i32, i32
  }
  func.func @transform_7(%arg0: i32) -> (i32, i32) {
    %c0_i32 = arith.constant 0 : i32
    %c0_i32_0 = arith.constant 0 : i32
    %c0_i32_1 = arith.constant 0 : i32
    return %c0_i32, %c0_i32_0 : i32, i32
  }
  func.func @transform_8(%arg0: i32) -> (i32, i32) {
    %c0_i32 = arith.constant 0 : i32
    %c0_i32_0 = arith.constant 0 : i32
    %c0_i32_1 = arith.constant 0 : i32
    return %c0_i32, %c0_i32_0 : i32, i32
  }
  func.func @transform_9(%arg0: i32) -> (i32, i32) {
    %c0_i32 = arith.constant 0 : i32
    %c0_i32_0 = arith.constant 0 : i32
    %c0_i32_1 = arith.constant 0 : i32
    return %c0_i32, %c0_i32_0 : i32, i32
  }
  func.func @transform_10(%arg0: i32) -> (i32, i32) {
    %c0_i32 = arith.constant 0 : i32
    %c0_i32_0 = arith.constant 0 : i32
    %c0_i32_1 = arith.constant 0 : i32
    return %c0_i32, %c0_i32_0 : i32, i32
  }
  func.func @transform_11(%arg0: i32) -> (i32, i32) {
    %c0_i32 = arith.constant 0 : i32
    %c0_i32_0 = arith.constant 0 : i32
    %c0_i32_1 = arith.constant 0 : i32
    return %c0_i32, %c0_i32_0 : i32, i32
  }
  func.func @transform_12(%arg0: i32) -> (i32, i32) {
    %c0_i32 = arith.constant 0 : i32
    %c0_i32_0 = arith.constant 0 : i32
    %c0_i32_1 = arith.constant 0 : i32
    return %c0_i32, %c0_i32_0 : i32, i32
  }
  func.func @transform_13(%arg0: i32) -> (i32, i32) {
    %c0_i32 = arith.constant 0 : i32
    %c0_i32_0 = arith.constant 0 : i32
    %c0_i32_1 = arith.constant 0 : i32
    return %c0_i32, %c0_i32_0 : i32, i32
  }
  func.func @transform_14(%arg0: i32) -> (i32, i32) {
    %c0_i32 = arith.constant 0 : i32
    %c0_i32_0 = arith.constant 0 : i32
    %c0_i32_1 = arith.constant 0 : i32
    return %c0_i32, %c0_i32_0 : i32, i32
  }
  func.func @transform_15(%arg0: i32) -> (i32, i32) {
    %c0_i32 = arith.constant 0 : i32
    %c0_i32_0 = arith.constant 0 : i32
    %c0_i32_1 = arith.constant 0 : i32
    return %c0_i32, %c0_i32_0 : i32, i32
  }
  func.func @transform_16(%arg0: i32) -> (i32, i32) {
    %c0_i32 = arith.constant 0 : i32
    %c0_i32_0 = arith.constant 0 : i32
    %c0_i32_1 = arith.constant 0 : i32
    return %c0_i32, %c0_i32_0 : i32, i32
  }
  func.func @transform_17(%arg0: i32) -> (i32, i32, i32) {
    %c0_i32 = arith.constant 0 : i32
    %c0_i32_0 = arith.constant 0 : i32
    %c0_i32_1 = arith.constant 0 : i32
    return %arg0, %c0_i32, %c0_i32_0 : i32, i32, i32
  }
}

</mosaic_0001>

<bundles_post_ra>
// kernel: tpu_custom_call.1
= control target key start
LH: loop header
LB: loop body
LE: loop exit
PB: predicated region body
PF: predicated region fallthrough
CT: control target
= control target key end

     0   :  { %s2011_s0 = inlined_call_operand.vmem [shape: f32[2,16,20], index: 0, kind: input, shape index: {}]   ;;  %s2012_s1 = inlined_call_operand.vmem [shape: bf16[20,32], index: 1, kind: input, shape index: {}]   ;;  %s2013_s2 = inlined_call_operand.hbm [shape: f32[1,32], index: 2, kind: input, shape index: {}]   ;;  %s2014_s3 = inlined_call_operand.vmem [shape: bf16[32,16], index: 3, kind: input, shape index: {}]   ;;  %s2015_s4 = inlined_call_operand.vmem [shape: f32[5,16], index: 4, kind: input, shape index: {}]   ;;  %s2016_s5 = inlined_call_operand.vmem [shape: bf16[16,32], index: 5, kind: input, shape index: {}]   ;;  %s2017_s6 = inlined_call_operand.hbm [shape: f32[1,32], index: 6, kind: input, shape index: {}]   ;;  %s2018_s7 = inlined_call_operand.vmem [shape: bf16[32,16], index: 7, kind: input, shape index: {}]   ;;  %s2019_s8 = inlined_call_operand.hbm [shape: f32[5,16], index: 8, kind: input, shape index: {}]   ;;  %s2020_s9 = inlined_call_operand.hbm [shape: bf16[16,32], index: 9, kind: input, shape index: {}]   ;;  %s2021_s10 = inlined_call_operand.hbm [shape: f32[1,32], index: 10, kind: input, shape index: {}]   ;;  %s2022_s11 = inlined_call_operand.vmem [shape: bf16[32,16], index: 11, kind: input, shape index: {}]   ;;  %s2023_s12 = inlined_call_operand.hbm [shape: f32[5,16], index: 12, kind: input, shape index: {}]   ;;  %s2024_s13 = inlined_call_operand.vmem [shape: bf16[16,32], index: 13, kind: input, shape index: {}]   ;;  %s2025_s14 = inlined_call_operand.vmem [shape: f32[1,32], index: 14, kind: input, shape index: {}]   ;;  %s2026_s15 = inlined_call_operand.vmem [shape: bf16[32,128], index: 15, kind: input, shape index: {}]   ;;  %s2027_s16 = inlined_call_operand.vmem [shape: f32[1,128], index: 16, kind: input, shape index: {}]   ;;  %s2028_s17 = inlined_call_operand.hbm [shape: f32[2,16,128], index: 17, kind: output, shape index: {}]  }
   0x1   :  { %2039 = sst [smem:[#allocation26_spill]] %s2011_s0 }
   0x2   :  { %2040 = sst [smem:[#allocation27_spill]] %s2012_s1 }
   0x3   :  { %2041 = sst [smem:[#allocation28_spill]] %s2013_s2 }
   0x4   :  { %2042 = sst [smem:[#allocation29_spill]] %s2017_s6 }
   0x5   :  { %2043 = sst [smem:[#allocation30_spill]] %s2020_s9 }
   0x6   :  { %2044 = sst [smem:[#allocation31_spill]] %s2028_s17 }
   0x7   :  { %22 = vsyncpa [#allocation3], 0 }
   0x8   :  { %23 = vsyncpa [#allocation6], 0 }
   0x9   :  { %24 = vsyncpa [#allocation9], 0 }
   0xa   :  { %25 = vsyncpa [#allocation12], 0 }
   0xb   :  { %26 = vsyncpa [#allocation4], 0 }
   0xc   :  { %28 = vsyncpa [#allocation4 + $0x1], 0  ;;  %s1783_s24 = smov 0   ;;  %s1785_s25 = smov 0  }
   0xd   :  { %s1787_s26 = smov 0   ;;  %s1789_s27 = smov 0  }
   0xe LB: > { %2045 = sst [smem:[#allocation19_spill]] %s1669_s24  ;;  %s1804_s28 = sadd.s32 4294967295, %s1681_s27   ;;  %s1681_s27 = sphi %s1789_s27, %s2066_s27   ;;  %s1677_s26 = sphi %s1787_s26, %s2068_s26   ;;  %s1673_s25 = sphi %s1785_s25, %s2070_s25   ;;  %s1669_s24 = sphi %s1783_s24, %s2069_s24  }
   0xf   : > { %2046 = sst [smem:[#allocation20_spill]] %s1677_s26  ;;  %s1220_s29 = sadd.s32 4294967294, %s1681_s27  }
  0x10   : > { %2047 = sst [smem:[#allocation21_spill]] %s1681_s27  ;;  %s1808_s0 = sadd.s32 1, %s1681_s27  }
  0x11   : > { %2048 = sst [smem:[#allocation22_spill]] %s1808_s0  ;;  %s403_s30 = sadd.s32 1, %s1677_s26 }
  0x12   : > { %s400_s18 = ssub.s32 %s1681_s27, %s1808_s0  ;;  %p413_p0 = scmp.ne.s32.totalorder %s1677_s26, %s1673_s25 }
  0x13   : > { %p401_p1 = scmp.eq.s32.totalorder %s400_s18, 0  ;;  %p414_p2 = scmp.eq.s32.totalorder %s1804_s28, 1 }
  0x14   : > { %p419_p3 = scmp.ne.s32.totalorder %s1673_s25, %s1669_s24  ;;  %p420_p4 = scmp.eq.s32.totalorder %s1220_s29, 1 }
  0x15   : > { %s1819_s19 = scalar_select %p401_p1, %s1677_s26, %s403_s30  }
  0x16   : > { %p1821_p5 = por %p414_p2, %p413_p0  ;;  %p1825_p6 = por %p420_p4, %p419_p3 }
  0x17   : > { %2049 = sst [smem:[#allocation23_spill]] %s1819_s19  ;;  %p1221_p7 = scmp.ge.s32.totalorder %s1681_s27, 1 }
  0x18   : > { %s2050_s1 = scalar_select %p1821_p5, 1, 0 }
  0x19   : > { %s2052_s20 = scalar_select %p1825_p6, 1, 0 }
  0x1a   : > { %2051 = sst [smem:[#allocation24_spill]] %s2050_s1  ;;  %p427_p8 = scmp.lt.s32.totalorder %s1681_s27, 3 }
  0x1b   : > { %2053 = sst [smem:[#allocation25_spill]] %s2052_s20  ;;  %p1363_p9 = scmp.eq.s32.totalorder %s1804_s28, 0 }
  0x1c   : > { %p1832_p10 = pnand %p1221_p7, %p427_p8  ;;  %s2055_s6 = sld [smem:[#allocation29_spill]] }
  0x1d   : > { %s1683_s30 = smov [#allocation5]   ;;  %s2056_s9 = sld [smem:[#allocation30_spill]] }
  0x1e   : > { %p1340_p11 = pneg %p1832_p10  ;;  %s465_s18 = sshll.u32 %s1683_s30, 4  ;;  %s466_s18 = int_to_ptr.vmem [resolvable:$true] %s465_s18 }
  0x1f   : > { %s1684_s22 = smov [#allocation8]   ;;  %s1685_s30 = smov 64  }
  0x20   : > { %p1846_p12 = pnand %p1363_p9, %p1340_p11  ;;  %s491_s23 = sshll.u32 %s1684_s22, 4  ;;  %s492_s23 = int_to_ptr.vmem [resolvable:$true] %s491_s23 }
  0x21   : > { %s2058_s2 = sld [smem:[#allocation28_spill]]  ;;  %s1687_s24 = smov [#allocation2]  }
  0x22   : > { %s463_s29 = sshll.u32 %s2055_s6, 4  ;;  %s1686_s6 = smov 4   ;;  %s464_s29 = int_to_ptr.hbm [resolvable:$true] %s463_s29 }
  0x23   : > { %s489_s0 = sshll.u32 %s2056_s9, 4  ;;  %s444_s27 = sshll.u32 %s1687_s24, 4  ;;  %s490_s0 = int_to_ptr.hbm [resolvable:$true] %s489_s0  ;;  %s445_s27 = int_to_ptr.vmem [resolvable:$true] %s444_s27 }
  0x24   : > { %1346 = dma.hbm_to_vmem [thread:$0]  (!%p1846_p12), %s464_s29, 16, %s466_s18, [#allocation6]  }
  0x25   : > { %1352 = dma.hbm_to_vmem [thread:$0]  (!%p1846_p12), %s490_s0, 128, %s492_s23, [#allocation9], %s1685_s30, %s1685_s30, %s1686_s6  }
  0x26   : > { %s478_s22 = sshll.u32 %s2019_s8, 4  ;;  %s1688_s29 = smov [#allocation7]   ;;  %s479_s22 = int_to_ptr.hbm [resolvable:$true] %s478_s22 }
  0x27   : > { %s442_s9 = sshll.u32 %s2058_s2, 4  ;;  %s480_s18 = sshll.u32 %s1688_s29, 4  ;;  %s443_s9 = int_to_ptr.hbm [resolvable:$true] %s442_s9  ;;  %s481_s18 = int_to_ptr.vmem [resolvable:$true] %s480_s18 }
  0x28   : > { %1343 = dma.hbm_to_vmem [thread:$0]  (!%p1846_p12), %s443_s9, 16, %s445_s27, [#allocation3]  }
  0x29   : > { %s504_s23 = sshll.u32 %s2021_s10, 4  ;;  %s519_s26 = sshll.u32 %s2023_s12, 4  ;;  %s505_s23 = int_to_ptr.hbm [resolvable:$true] %s504_s23  ;;  %s520_s26 = int_to_ptr.hbm [resolvable:$true] %s519_s26 }
  0x2a   : > { %1349 = dma.hbm_to_vmem [thread:$0]  (!%p1846_p12), %s479_s22, 128, %s481_s18, [#allocation6]  }
  0x2b   : > { %s1689_s17 = smov [#allocation10]   ;;  %s1690_s9 = smov [#allocation11]  }
  0x2c   : > { %s506_s1 = sshll.u32 %s1689_s17, 4  ;;  %s521_s27 = sshll.u32 %s1690_s9, 4  ;;  %s507_s1 = int_to_ptr.vmem [resolvable:$true] %s506_s1  ;;  %s522_s27 = int_to_ptr.vmem [resolvable:$true] %s521_s27 }
  0x2d   : > { %1355 = dma.hbm_to_vmem [thread:$0]  (!%p1846_p12), %s505_s23, 16, %s507_s1, [#allocation9]  }
  0x2e   : > { %1358 = dma.hbm_to_vmem [thread:$0]  (!%p1846_p12), %s520_s26, 128, %s522_s27, [#allocation12]  }
  0x2f   : > { %554 = sbr.rel (%p1832_p10) target bundleno = 1258 (0x4ea), region = 88 }
  0x34   : > { %1648 = dma.done.wait (%p1363_p9), [#allocation3], 16  }
  0x35   : > { %1650 = vsyncadd (%p1363_p9), [#allocation3], 4294967280 }
  0x36   : > { %1652 = dma.done.wait (%p1363_p9), [#allocation6], 144  }
  0x37   : > { %1654 = vsyncadd (%p1363_p9), [#allocation6], 4294967152 }
  0x38   : > { %1656 = dma.done.wait (%p1363_p9), [#allocation9], 144  }
  0x39   : > { %1658 = vsyncadd (%p1363_p9), [#allocation9], 4294967152 }
  0x3a   : > { %1660 = dma.done.wait (%p1363_p9), [#allocation12], 128  }
  0x3b   : > { %1662 = vsyncadd (%p1363_p9), [#allocation12], 4294967168  ;;  %p632_p13 = scmp.lt.s32.totalorder %s1804_s28, 1  ;;  %s2059_s22 = sld [smem:[#allocation27_spill]]  ;;  %vm661_vm0 = vcmask 1041408   ;;  %vm657_vm1 = vcmask 162816  }
  0x3c   : > { %s2060_s0 = sld [smem:[#allocation26_spill]]  ;;  %v1303_v8 = vld [vmem:[%s2014_s3 + $0x8] sm:$0xff]  ;;  %v1302_v9 = vld [vmem:[%s2014_s3] sm:$0xff]  ;;  %vm698_vm2 = vcmask 261120   ;;  %vm735_vm3 = vcmask 1043456   ;;  %vm747_vm4 = vcmask 1045504  }
  0x3d   : > { %s633_s20 = scalar_select %p632_p13, %s1804_s28, 1  ;;  %708 = vmatpush.bf16.msra.mxu1 %v1303_v8  ;;  %v1418_v11 = vld [vmem:[#allocation2] ss:$0 sm:$0xff]  ;;  %vm779_vm5 = vcmask 130048   ;;  %v1306_v61 = vld [vmem:[%s2018_s7 + $0x8] sm:$0xff]  ;;  %vm1033_vm6 = vcmask 1046528  }
  0x3e   : > { %v1304_v18 = vld [vmem:[%s2016_s5] sm:$0xff]  ;;  %825 = vmatpush.bf16.msra.mxu3 %v1306_v61  ;;  %s629_s18 = sand.u32 1, %s1673_s25   ;;  %s1313_s24 = sshll.u32 %s1804_s28, 4 }
  0x3f   : > { %s1300_s29 = sshll.u32 %s633_s20, 4  ;;  %790 = vmatpush.bf16.msra.mxu2 %v1304_v18  ;;  %v716_v19 = vld [vmem:[%s2015_s4] sm:$0x1f]  ;;  %s1236_s6 = sshll.u32 %s629_s18, 4 }
  0x40   : > { %v717_v20 = vperm.slane %v716_v19, 0  ;;  %v730_v24 = vperm.slane %v716_v19, 1  ;;  %v742_v30 = vperm.slane %v716_v19, 2  ;;  %v754_v43 = vperm.slane %v716_v19, 3  ;;  %v1305_v62 = vld [vmem:[%s2018_s7] sm:$0xff]  ;;  %s631_s26 = scalar_lea.vmem [#allocation13], %s1236_s6 }
  0x41   : > { %v643_v0 = vld [vmem:[%s2059_s22 + $0x8] sm:$0x3]  ;;  %v1301_v4 = vld [vmem:[%s2059_s22] sm:$0xff]  ;;  %709 = vmatpush.bf16.msra.mxu1 %v1302_v9  ;;  %v761_v44 = vperm.slane %v716_v19, 4  ;;  %s2062_s9 = sld [smem:[#allocation31_spill]]  ;;  %s1095_s20 = sshll.u32 %s631_s26, 4  ;;  %s1096_s20 = int_to_ptr.vmem [resolvable:$true] %s1095_s20 }
  0x42   : > { %v653_v1 = vunpack.c.l.b16 %v643_v0  ;;  %s636_s23 = scalar_lea.vmem %s2060_s0, %s1300_s29  ;;  %826 = vmatpush.bf16.msra.mxu3 %v1305_v62  ;;  %v1419_v0 = vld [vmem:[#allocation5] ss:$0 sm:$0xff]  ;;  %v833_v8 = vld [vmem:[#allocation7] sm:$0x1f]  ;;  %s1083_s19 = scalar_lea.sflag [#allocation4], %s629_s18 }
  0x43   : > { %v638_v5 = vld [vmem:[%s636_s23] sm:$0xff]  ;;  %v639_v6 = vld [vmem:[%s636_s23 + $0x8] sm:$0xff]  ;;  %v858_v19 = vperm.slane %v833_v8, 2 }
  0x44   : > { %v655_v2 = vpack.c.b16 %v653_v1, %v653_v1  ;;  %v640_v7 = vpack.c.bf16 %v639_v6, %v638_v5  ;;  %v1309_v9 = vld [vmem:[%s2022_s11 + $0x8] sm:$0xff] }
  0x46   : > { %v663_v3 = vsel %vm661_vm0, %v655_v2, 0 }
  0x47   : > { %671 = vmatpush.bf16.msra.mxu0 %v663_v3  ;;  %s1094_s27 = scalar_lea.hbm %s2062_s9, %s1313_s24  ;;  %s1623_s23 = scalar_lea.hbm %s2062_s9, 32 }
  0x48   : > { %s1097_s21 = sshll.u32 %s1094_s27, 4  ;;  %s1098_s21 = int_to_ptr.hbm [resolvable:$true] %s1097_s21 }
  0x49   : > { %s1617_s29 = sshra.s32 %s1098_s21, 4  ;;  %s1618_s29 = int_to_ptr.hbm [resolvable:$true] %s1617_s29 }
  0x4a   : > { %s1619_s0 = scalar_lea.hbm %s1618_s29, 16  ;;  %p1624_p3 = scmp.lt.s32.totalorder %s1618_s29, %s2062_s9 }
  0x4b   : > { %672 = vmatpush.bf16.msra.mxu0 %v1301_v4  ;;  %p1620_p0 = scmp.ne.s32.totalorder %s1618_s29, %s1619_s0  ;;  %p1625_p4 = scmp.lt.s32.totalorder %s1623_s23, %s1619_s0 }
  0x4d   : > { %p1621_p1 = pnand %p1620_p0, %p1821_p5  ;;  %p1626_p7 = por %p1625_p4, %p1624_p3 }
  0x4e   : > { %1243 = vmatmul.msk.bf16.vlgmr.msra.gmra.mxu0 %vm657_vm1, %v640_v7  ;;  %v1307_v7 = vld [vmem:[#allocation8] sm:$0xff] }
  0x4f   : > { %906 = vmatpush.bf16.msrb.mxu2 %v1307_v7  ;;  %941 = vmatpush.bf16.msrb.mxu0 %v1309_v9  ;;  %p1622_p2 = pneg %p1621_p1 }
  0x51   : > { %p1627_p8 = pnand %p1626_p7, %p1622_p2 }
  0xcb   : > { %v674_v10 = vpop.f32.mrf.mxu0 }
  0xcc   : > { %v675_v12 = vadd.f32 %v1418_v11, %v674_v10  ;;  %v834_v10 = vperm.slane %v833_v8, 0 }
  0xce   : > { %v679_v15 = vmax.f32 %v675_v12, 0.0  ;;  %v847_v12 = vperm.slane %v833_v8, 1 }
  0xd3   : > { %v676_v13 = vpop.f32.mrf.mxu0 }
  0xd4   : > { %v677_v14 = vadd.f32 %v1418_v11, %v676_v13 }
  0xd6   : > { %v680_v16 = vmax.f32 %v677_v14, 0.0 }
  0xd8   : > { %v681_v17 = vpack.c.bf16 %v680_v16, %v679_v15 }
  0xda   : > { %1252 = vmatmul.msk.bf16.vlgmr.msra.gmra.mxu1 %vm698_vm2, %v681_v17 }
 0x157   : > { %v711_v21 = vpop.f32.mrf.mxu1 }
 0x158   : > { %v724_v22 = vrot.slane %v711_v21, 6  ;;  %v718_v23 = vmul.f32 %v717_v20, %v711_v21  ;;  %v736_v26 = vrot.slane %v711_v21, 4  ;;  %v748_v31 = vrot.slane %v711_v21, 2 }
 0x15a   : > { %v729_v25 = vsel %vm661_vm0, 0.0, %v724_v22  ;;  %v720_v27 = vadd.f32 %v718_v23, %v711_v21  ;;  %v741_v29 = vsel %vm735_vm3, 0.0, %v736_v26  ;;  %v753_v45 = vsel %vm747_vm4, 0.0, %v748_v31 }
 0x15b   : > { %v731_v28 = vmul.f32 %v730_v24, %v729_v25  ;;  %v743_v41 = vmul.f32 %v742_v30, %v741_v29  ;;  %v755_v52 = vmul.f32 %v754_v43, %v753_v45 }
 0x15d   : > { %v733_v37 = vadd.f32 %v731_v28, %v720_v27 }
 0x15f   : > { %v713_v32 = vpop.f32.mrf.mxu1  ;;  %v745_v49 = vadd.f32 %v743_v41, %v733_v37 }
 0x160   : > { %v719_v33 = vmul.f32 %v717_v20, %v713_v32  ;;  %v725_v34 = vrot.slane %v713_v32, 6  ;;  %v737_v35 = vrot.slane %v713_v32, 4  ;;  %v749_v36 = vrot.slane %v713_v32, 2 }
 0x161   : > { %v757_v55 = vadd.f32 %v755_v52, %v745_v49 }
 0x162   : > { %v721_v38 = vadd.f32 %v719_v33, %v713_v32  ;;  %v726_v39 = vsel %vm661_vm0, %v724_v22, %v725_v34  ;;  %v738_v40 = vsel %vm735_vm3, %v736_v26, %v737_v35  ;;  %v750_v46 = vsel %vm747_vm4, %v748_v31, %v749_v36 }
 0x163   : > { %v732_v42 = vmul.f32 %v730_v24, %v726_v39  ;;  %v744_v48 = vmul.f32 %v742_v30, %v738_v40  ;;  %v760_v50 = vsel %vm747_vm4, %v749_v36, 0.0  ;;  %v756_v53 = vmul.f32 %v754_v43, %v750_v46 }
 0x164   : > { %v762_v54 = vmul.f32 %v761_v44, %v750_v46  ;;  %v763_v57 = vmul.f32 %v761_v44, %v760_v50  ;;  %v869_v30 = vperm.slane %v833_v8, 3  ;;  %v876_v31 = vperm.slane %v833_v8, 4 }
 0x165   : > { %v734_v47 = vadd.f32 %v732_v42, %v721_v38 }
 0x166   : > { %v1924_v58 = vadd.f32 %v762_v54, %v757_v55  ;;  %v1420_v55 = vld [vmem:[#allocation10] ss:$0 sm:$0xff] }
 0x167   : > { %v746_v51 = vadd.f32 %v744_v48, %v734_v47 }
 0x169   : > { %v758_v56 = vadd.f32 %v756_v53, %v746_v51  ;;  %v1308_v53 = vld [vmem:[%s2022_s11] sm:$0xff] }
 0x16a   : > { %942 = vmatpush.bf16.msrb.mxu0 %v1308_v53 }
 0x16b   : > { %v1926_v59 = vadd.f32 %v763_v57, %v758_v56 }
 0x16d   : > { %v766_v60 = vpack.c.bf16 %v1926_v59, %v1924_v58 }
 0x16f   : > { %1257 = vmatmul.msk.bf16.vlgmr.msra.gmra.mxu2 %vm779_vm5, %v766_v60 }
 0x1f2   : > { %v792_v63 = vpop.f32.mrf.mxu2 }
 0x1f3   : > { %v793_v1 = vadd.f32 %v1419_v0, %v792_v63 }
 0x1f5   : > { %v797_v4 = vmax.f32 %v793_v1, 0.0 }
 0x1fa   : > { %v794_v2 = vpop.f32.mrf.mxu2 }
 0x1fb   : > { %v795_v3 = vadd.f32 %v1419_v0, %v794_v2 }
 0x1fd   : > { %v798_v5 = vmax.f32 %v795_v3, 0.0 }
 0x1ff   : > { %v799_v6 = vpack.c.bf16 %v798_v5, %v797_v4 }
 0x201   : > { %1266 = vmatmul.msk.bf16.vlgmr.msra.gmra.mxu3 %vm698_vm2, %v799_v6 }
 0x284   : > { %v828_v11 = vpop.f32.mrf.mxu3 }
 0x285   : > { %v835_v13 = vmul.f32 %v834_v10, %v828_v11  ;;  %v841_v14 = vrot.slane %v828_v11, 6  ;;  %v852_v16 = vrot.slane %v828_v11, 4  ;;  %v863_v20 = vrot.slane %v828_v11, 2 }
 0x287   : > { %v846_v15 = vsel %vm661_vm0, 0.0, %v841_v14  ;;  %v837_v17 = vadd.f32 %v835_v13, %v828_v11  ;;  %v857_v21 = vsel %vm735_vm3, 0.0, %v852_v16  ;;  %v868_v29 = vsel %vm747_vm4, 0.0, %v863_v20 }
 0x288   : > { %v848_v18 = vmul.f32 %v847_v12, %v846_v15  ;;  %v859_v28 = vmul.f32 %v858_v19, %v857_v21  ;;  %v870_v38 = vmul.f32 %v869_v30, %v868_v29 }
 0x28a   : > { %v850_v22 = vadd.f32 %v848_v18, %v837_v17 }
 0x28c   : > { %v830_v23 = vpop.f32.mrf.mxu3  ;;  %v861_v36 = vadd.f32 %v859_v28, %v850_v22 }
 0x28d   : > { %v836_v24 = vmul.f32 %v834_v10, %v830_v23  ;;  %v842_v25 = vrot.slane %v830_v23, 6  ;;  %v853_v26 = vrot.slane %v830_v23, 4  ;;  %v864_v27 = vrot.slane %v830_v23, 2 }
 0x28e   : > { %v872_v45 = vadd.f32 %v870_v38, %v861_v36 }
 0x28f   : > { %v838_v32 = vadd.f32 %v836_v24, %v830_v23  ;;  %v843_v33 = vsel %vm661_vm0, %v841_v14, %v842_v25  ;;  %v854_v34 = vsel %vm735_vm3, %v852_v16, %v853_v26  ;;  %v865_v35 = vsel %vm747_vm4, %v863_v20, %v864_v27 }
 0x290   : > { %v849_v37 = vmul.f32 %v847_v12, %v843_v33  ;;  %v860_v40 = vmul.f32 %v858_v19, %v854_v34  ;;  %v877_v41 = vmul.f32 %v876_v31, %v865_v35  ;;  %v875_v42 = vsel %vm747_vm4, %v864_v27, 0.0 }
 0x291   : > { %v871_v44 = vmul.f32 %v869_v30, %v865_v35  ;;  %v878_v46 = vmul.f32 %v876_v31, %v875_v42 }
 0x292   : > { %v851_v39 = vadd.f32 %v849_v37, %v838_v32  ;;  %v879_v48 = vadd.f32 %v877_v41, %v872_v45 }
 0x294   : > { %v862_v43 = vadd.f32 %v860_v40, %v851_v39  ;;  %v881_v50 = vadd.f32 %v879_v48, %v1924_v58  ;;  %v1310_v58 = vld [vmem:[%s2024_s13] sm:$0xff] }
 0x295   : > { %1022 = vmatpush.bf16.msrb.mxu1 %v1310_v58 }
 0x296   : > { %v873_v47 = vadd.f32 %v871_v44, %v862_v43  ;;  %v1312_v43 = vld [vmem:[%s2026_s15 + $0x8] sm:$0xff]  ;;  %v1311_v44 = vld [vmem:[%s2026_s15] sm:$0xff] }
 0x297   : > { %1072 = vmatpush.bf16.msrb.mxu3 %v1312_v43 }
 0x298   : > { %v880_v49 = vadd.f32 %v878_v46, %v873_v47  ;;  %v1421_v46 = vld [vmem:[%s2025_s14] ss:$0 sm:$0xff] }
 0x29a   : > { %v882_v51 = vadd.f32 %v880_v49, %v1926_v59  ;;  %v949_v59 = vld [vmem:[#allocation11] sm:$0x1f] }
 0x29b   : > { %v950_v0 = vperm.slane %v949_v59, 0  ;;  %v963_v2 = vperm.slane %v949_v59, 1  ;;  %v974_v9 = vperm.slane %v949_v59, 2  ;;  %v985_v20 = vperm.slane %v949_v59, 3  ;;  %1073 = vmatpush.bf16.msrb.mxu3 %v1311_v44 }
 0x29c   : > { %v883_v52 = vpack.c.bf16 %v882_v51, %v881_v50  ;;  %v992_v21 = vperm.slane %v949_v59, 4 }
 0x29e   : > { %1271 = vmatmul.msk.bf16.vlgmr.msrb.gmra.mxu2 %vm779_vm5, %v883_v52 }
 0x321   : > { %v908_v54 = vpop.f32.mrf.mxu2 }
 0x322   : > { %v909_v56 = vadd.f32 %v1420_v55, %v908_v54 }
 0x324   : > { %v913_v61 = vmax.f32 %v909_v56, 0.0 }
 0x329   : > { %v910_v57 = vpop.f32.mrf.mxu2 }
 0x32a   : > { %v911_v60 = vadd.f32 %v1420_v55, %v910_v57 }
 0x32c   : > { %v914_v62 = vmax.f32 %v911_v60, 0.0 }
 0x32e   : > { %v915_v63 = vpack.c.bf16 %v914_v62, %v913_v61  ;;  %v1422_v61 = vld [vmem:[%s2027_s16] ss:$0 sm:$0xff] }
 0x330   : > { %1280 = vmatmul.msk.bf16.vlgmr.msrb.gmra.mxu0 %vm698_vm2, %v915_v63 }
 0x3ad   : > { %v944_v1 = vpop.f32.mrf.mxu0 }
 0x3ae   : > { %v957_v3 = vrot.slane %v944_v1, 6  ;;  %v951_v4 = vmul.f32 %v950_v0, %v944_v1  ;;  %v968_v6 = vrot.slane %v944_v1, 4  ;;  %v979_v10 = vrot.slane %v944_v1, 2 }
 0x3b0   : > { %v962_v5 = vsel %vm661_vm0, 0.0, %v957_v3  ;;  %v953_v8 = vadd.f32 %v951_v4, %v944_v1  ;;  %v973_v11 = vsel %vm735_vm3, 0.0, %v968_v6  ;;  %v984_v19 = vsel %vm747_vm4, 0.0, %v979_v10 }
 0x3b1   : > { %v964_v7 = vmul.f32 %v963_v2, %v962_v5  ;;  %v975_v18 = vmul.f32 %v974_v9, %v973_v11  ;;  %v986_v28 = vmul.f32 %v985_v20, %v984_v19 }
 0x3b3   : > { %v966_v13 = vadd.f32 %v964_v7, %v953_v8 }
 0x3b5   : > { %v946_v12 = vpop.f32.mrf.mxu0  ;;  %v977_v27 = vadd.f32 %v975_v18, %v966_v13 }
 0x3b6   : > { %v952_v14 = vmul.f32 %v950_v0, %v946_v12  ;;  %v958_v15 = vrot.slane %v946_v12, 6  ;;  %v969_v16 = vrot.slane %v946_v12, 4  ;;  %v980_v17 = vrot.slane %v946_v12, 2 }
 0x3b7   : > { %v988_v35 = vadd.f32 %v986_v28, %v977_v27 }
 0x3b8   : > { %v954_v22 = vadd.f32 %v952_v14, %v946_v12  ;;  %v959_v23 = vsel %vm661_vm0, %v957_v3, %v958_v15  ;;  %v970_v24 = vsel %vm735_vm3, %v968_v6, %v969_v16  ;;  %v981_v25 = vsel %vm747_vm4, %v979_v10, %v980_v17 }
 0x3b9   : > { %v965_v26 = vmul.f32 %v963_v2, %v959_v23  ;;  %v976_v30 = vmul.f32 %v974_v9, %v970_v24  ;;  %v993_v31 = vmul.f32 %v992_v21, %v981_v25  ;;  %v991_v32 = vsel %vm747_vm4, %v980_v17, 0.0 }
 0x3ba   : > { %v987_v34 = vmul.f32 %v985_v20, %v981_v25  ;;  %v994_v37 = vmul.f32 %v992_v21, %v991_v32 }
 0x3bb   : > { %v967_v29 = vadd.f32 %v965_v26, %v954_v22  ;;  %v995_v38 = vadd.f32 %v993_v31, %v988_v35 }
 0x3bd   : > { %v978_v33 = vadd.f32 %v976_v30, %v967_v29  ;;  %v997_v40 = vadd.f32 %v995_v38, %v881_v50 }
 0x3bf   : > { %v989_v36 = vadd.f32 %v987_v34, %v978_v33 }
 0x3c1   : > { %v996_v39 = vadd.f32 %v994_v37, %v989_v36 }
 0x3c3   : > { %v998_v41 = vadd.f32 %v996_v39, %v882_v51 }
 0x3c5   : > { %v999_v42 = vpack.c.bf16 %v998_v41, %v997_v40 }
 0x3c7   : > { %1285 = vmatmul.msk.bf16.vlgmr.msrb.gmra.mxu1 %vm779_vm5, %v999_v42 }
 0x444   : > { %v1024_v45 = vpop.f32.mrf.mxu1 }
 0x445   : > { %v1025_v47 = vadd.f32 %v1421_v46, %v1024_v45 }
 0x447   : > { %v1029_v49 = vmax.f32 %v1025_v47, 0.0 }
 0x449   : > { %v1034_v52 = vrot.slane %v1029_v49, 1 }
 0x44c   : > { %v1026_v48 = vpop.f32.mrf.mxu1 }
 0x44d   : > { %v1027_v50 = vadd.f32 %v1421_v46, %v1026_v48 }
 0x44f   : > { %v1030_v51 = vmax.f32 %v1027_v50, 0.0 }
 0x451   : > { %v1035_v53 = vrot.slane %v1030_v51, 1 }
 0x453   : > { %v1036_v54 = vsel %vm1033_vm6, %v1034_v52, %v1035_v53  ;;  %v1039_v55 = vsel %vm1033_vm6, %v1035_v53, 0.0 }
 0x454   : > { %v1040_v56 = vmax.f32 %v1029_v49, %v1036_v54  ;;  %v1041_v57 = vmax.f32 %v1030_v51, %v1039_v55 }
 0x456   : > { %v1042_v60 = vpack.c.bf16 %v1041_v57, %v1040_v56 }
 0x458   : > { %1294 = vmatmul.msk.bf16.vlgmr.msrb.gmra.mxu3 %vm698_vm2, %v1042_v60 }
 0x4db   : > { %v1075_v62 = vpop.f32.mrf.mxu3 }
 0x4dc   : > { %v1076_v63 = vadd.f32 %v1422_v61, %v1075_v62 }
 0x4de   : > { %1080 = vst [vmem:[%s631_s26] sm:$0xff] %v1076_v63 }
 0x4e3   : > { %v1077_v58 = vpop.f32.mrf.mxu3 }
 0x4e4   : > { %v1078_v59 = vadd.f32 %v1422_v61, %v1077_v58 }
 0x4e6   : > { %1081 = vst [vmem:[%s631_s26 + $0x8] sm:$0xff] %v1078_v59 }
 0x4e7   : > { %1630 = shalt.err (!%p1627_p8)
}
 0x4e8   : > { %s1691_s18 = smov 128   ;;  %s1692_s26 = smov 8  }
 0x4e9   : > { %1338 = dma.vmem_to_hbm [thread:$0]  (%p1821_p5), %s1096_s20, 256, %s1098_s21, %s1083_s19, %s1691_s18, %s1691_s18, %s1692_s26  }
 0x4ea PF: > { %s2063_s1 = sld [smem:[#allocation21_spill]] }
 0x4eb   : > { %s2064_s27 = sld [smem:[#allocation19_spill]] }
 0x4f0   : > { %p1375_p9 = scmp.ge.s32.totalorder %s2063_s1, 2 }
 0x4f1   : > { %s1112_s28 = sand.u32 1, %s2064_s27  }
 0x4f2   : > { %p1360_p10 = pnand %p1375_p9, %p1825_p6  ;;  %s1113_s6 = scalar_lea.sflag [#allocation4], %s1112_s28 }
 0x4f4   : > { %p1361_p11 = pneg %p1360_p10 }
 0x4f6   : > { %1664 = dma.done.wait (%p1361_p11), %s1113_s6, 256  }
 0x4f7   : > { %1666 = vsyncadd (%p1361_p11), %s1113_s6, 4294967040  ;;  %s2066_s27 = sld [smem:[#allocation22_spill]]  ;;  %s2069_s24 = smov %s1673_s25 }
 0x4f8   : > { %s2067_s29 = sld [smem:[#allocation20_spill]] }
 0x4f9   : > { %s2068_s26 = sld [smem:[#allocation23_spill]] }
 0x4fd   : > { %p31_p12 = scmp.ge.s32.totalorder %s2066_s27, 4  }
 0x4fe   : > { %s2070_s25 = smov %s2067_s29 }
 0x4ff   :  { %33 = sbr.rel (!%p31_p12) target bundleno = 14 (0xe), region = 148 }
 0x504   :  { %1119 = vsyncpa [#allocation3], 1 }
 0x505   :  { %1121 = vsyncpa [#allocation3 + $0x1], 1 }
 0x506   :  { %1122 = vsyncpa [#allocation6], 1 }
 0x507   :  { %1123 = vsyncpa [#allocation9], 1 }
 0x508   :  { %1124 = vsyncpa [#allocation12], 1 }
 0x509   :  { %1125 = vsyncpa [#allocation4], 1 }
 0x50a   :  { %1127 = vsyncpa [#allocation4 + $0x1], 1 }

</bundles_post_ra>
